<compile_context>
chip_gen: v7x
topology: tpu7x:2x2x1
jax: 0.10.0
libtpu: 0.0.40
codegen_flags: <defaults>
</compile_context>

<pallas_src>
import jax
import jax.numpy as jnp
from jax.experimental import pallas as pl
from jax.experimental.pallas import tpu as pltpu

_EPS = 1e-5
_LANE = 128


def _batch_net_kernel(x_ref,
                      w1_ref, g1_ref, be1_ref,
                      w2_ref, g2_ref, be2_ref,
                      w3_ref, b3_ref,
                      o_ref):
    # ---- layer 1: Linear (bias cancelled by BN) -> BatchNorm1d (batch stats) -> ReLU ----
    h = jnp.dot(x_ref[...], w1_ref[...], preferred_element_type=jnp.float32)
    mu = jnp.mean(h, axis=0, keepdims=True)
    d = h - mu
    var = jnp.mean(d * d, axis=0, keepdims=True)           # biased (÷B), like PyTorch fwd
    scale = g1_ref[...] * jax.lax.rsqrt(var + _EPS)         # EUP rsqrt, folded BN affine
    h = jnp.maximum(d * scale + be1_ref[...], 0.0)

    # ---- layer 2: Linear (bias cancelled by BN) -> BatchNorm1d (batch stats) -> ReLU ----
    h = jnp.dot(h.astype(jnp.bfloat16), w2_ref[...], preferred_element_type=jnp.float32)
    mu = jnp.mean(h, axis=0, keepdims=True)
    d = h - mu
    var = jnp.mean(d * d, axis=0, keepdims=True)
    scale = g2_ref[...] * jax.lax.rsqrt(var + _EPS)
    h = jnp.maximum(d * scale + be2_ref[...], 0.0)

    # ---- layer 3: Linear (lane-padded output, unmasked store) ----
    o_ref[...] = (jnp.dot(h.astype(jnp.bfloat16), w3_ref[...],
                          preferred_element_type=jnp.float32)
                  + b3_ref[...]).astype(o_ref.dtype)


def batch_net_forward(x, params):
    """x: [B, in_dim] float32.  params: dict of weights/biases/bn params (f32)."""
    B, in_dim = x.shape
    h1 = params["w1"].shape[1]
    h2 = params["w2"].shape[1]
    out_dim = params["w3"].shape[1]
    out_pad = ((out_dim + _LANE - 1) // _LANE) * _LANE      # lane-dense output width

    # bf16 matmul inputs: halves x / weight DMA bytes and VMEM footprint; f32 MXU accum.
    x_bf = x.astype(jnp.bfloat16)
    w1 = params["w1"].astype(jnp.bfloat16)
    w2 = params["w2"].astype(jnp.bfloat16)
    # zero-pad the last layer to 128 lanes; padded columns stay exactly zero.
    w3 = jnp.zeros((h2, out_pad), jnp.bfloat16).at[:, :out_dim].set(
        params["w3"].astype(jnp.bfloat16))
    b3 = jnp.zeros((1, out_pad), jnp.float32).at[:, :out_dim].set(params["b3"])

    vmem_spec = pl.BlockSpec(memory_space=pltpu.MemorySpace.VMEM)
    n_in = 9

    flops = 2 * B * (in_dim * h1 + h1 * h2 + h2 * out_pad)
    bytes_accessed = (x_bf.size * 2 + w1.size * 2 + w2.size * 2 + w3.size * 2
                      + (2 * h1 + 2 * h2 + out_pad) * 4 + B * out_pad * 4)
    cost = pl.CostEstimate(flops=flops, transcendentals=h1 + h2,
                           bytes_accessed=bytes_accessed)

    out_padded = pl.pallas_call(
        _batch_net_kernel,
        out_shape=jax.ShapeDtypeStruct((B, out_pad), jnp.float32),
        in_specs=[vmem_spec] * n_in,
        out_specs=vmem_spec,
        cost_estimate=cost,
    )(x_bf,
      w1, params["g1"], params["be1"],
      w2, params["g2"], params["be2"],
      w3, b3)
    return out_padded[:, :out_dim]


def init_params(key, in_dim, n_hidden_1, n_hidden_2, out_dim):
    """Deterministic init mimicking PyTorch defaults (U(-1/sqrt(fan_in), 1/sqrt(fan_in))).

    b1/b2 mirror the nn.Linear parameter set, but are NOT passed to the kernel: under
    training-mode BatchNorm a pre-BN per-feature bias cancels exactly.
    """
    ks = jax.random.split(key, 6)

    def lin(kw, kb, fan_in, fan_out):
        bound = 1.0 / jnp.sqrt(jnp.float32(fan_in))
        w = jax.random.uniform(kw, (fan_in, fan_out), jnp.float32, -bound, bound)
        b = jax.random.uniform(kb, (1, fan_out), jnp.float32, -bound, bound)
        return w, b

    w1, b1 = lin(ks[0], ks[1], in_dim, n_hidden_1)
    w2, b2 = lin(ks[2], ks[3], n_hidden_1, n_hidden_2)
    w3, b3 = lin(ks[4], ks[5], n_hidden_2, out_dim)
    return {
        "w1": w1, "b1": b1,
        "g1": jnp.ones((1, n_hidden_1), jnp.float32),
        "be1": jnp.zeros((1, n_hidden_1), jnp.float32),
        "w2": w2, "b2": b2,
        "g2": jnp.ones((1, n_hidden_2), jnp.float32),
        "be2": jnp.zeros((1, n_hidden_2), jnp.float32),
        "w3": w3, "b3": b3,
    }


def _reference_forward(x, p):
    """Pure-JAX reference with identical numerics (bf16 matmul inputs, f32 accumulation,
    pre-BN biases omitted because they cancel under batch-stats BN)."""
    def bn_relu(h, g, be):
        mu = h.mean(0, keepdims=True)
        d = h - mu
        var = (d * d).mean(0, keepdims=True)
        return jnp.maximum(d * (g * jax.lax.rsqrt(var + _EPS)) + be, 0.0)

    h = jnp.dot(x.astype(jnp.bfloat16), p["w1"].astype(jnp.bfloat16),
                preferred_element_type=jnp.float32)
    h = bn_relu(h, p["g1"], p["be1"])
    h = jnp.dot(h.astype(jnp.bfloat16), p["w2"].astype(jnp.bfloat16),
                preferred_element_type=jnp.float32)
    h = bn_relu(h, p["g2"], p["be2"])
    return jnp.dot(h.astype(jnp.bfloat16), p["w3"].astype(jnp.bfloat16),
                   preferred_element_type=jnp.float32) + p["b3"]


if __name__ == "__main__":
    # Small MNIST-like shapes: batch=8, in_dim=32, hidden1=64, hidden2=32, out_dim=10.
    B, IN, H1, H2, OUT = 8, 32, 64, 32, 10
    key = jax.random.PRNGKey(0)
    kx, kp = jax.random.split(key)
    x = jax.random.normal(kx, (B, IN), jnp.float32)
    params = init_params(kp, IN, H1, H2, OUT)

    out = batch_net_forward(x, params)
    out = jax.block_until_ready(out)

    ref = _reference_forward(x, params)
    assert out.shape == (B, OUT)
    assert jnp.allclose(out, ref, atol=1e-2, rtol=1e-2), "mismatch vs pure-JAX reference"

    print("KERNEL_OK")
</pallas_src>

<mosaic_0001>
module attributes {stable_mosaic.version = 11 : i64} {
  func.func @_batch_net_kernel(%arg0: memref<8x32xbf16, #tpu.memory_space<vmem>>, %arg1: memref<32x64xbf16, #tpu.memory_space<vmem>>, %arg2: memref<1x64xf32, #tpu.memory_space<vmem>>, %arg3: memref<1x64xf32, #tpu.memory_space<vmem>>, %arg4: memref<64x32xbf16, #tpu.memory_space<vmem>>, %arg5: memref<1x32xf32, #tpu.memory_space<vmem>>, %arg6: memref<1x32xf32, #tpu.memory_space<vmem>>, %arg7: memref<32x128xbf16, #tpu.memory_space<vmem>>, %arg8: memref<1x128xf32, #tpu.memory_space<vmem>>, %arg9: memref<8x128xf32, #tpu.memory_space<vmem>>) attributes {dimension_semantics = [], scalar_prefetch = 0 : i64, scratch_operands = 0 : i64, tpu.core_type = #tpu.core_type<tc>} {
    %c0 = arith.constant 0 : index
    %c0_0 = arith.constant 0 : index
    %0 = vector.load %arg0[%c0, %c0_0] : memref<8x32xbf16, #tpu.memory_space<vmem>>, vector<8x32xbf16>
    %c0_1 = arith.constant 0 : index
    %c0_2 = arith.constant 0 : index
    %1 = vector.load %arg1[%c0_1, %c0_2] : memref<32x64xbf16, #tpu.memory_space<vmem>>, vector<32x64xbf16>
    %cst = arith.constant dense<0.000000e+00> : vector<8x64xf32>
    %2 = tpu.matmul %0, %1, %cst {dimension_numbers = #tpu.dot_dimension_numbers<[1], [0], [0], [1], [0, 0, 1, 1], [], []>} : vector<8x32xbf16>, vector<32x64xbf16>, vector<8x64xf32> -> vector<8x64xf32>
    %cst_3 = arith.constant dense<0.000000e+00> : vector<64xf32>
    %3 = vector.multi_reduction <add>, %2, %cst_3 [0] : vector<8x64xf32> to vector<64xf32>
    %4 = vector.shape_cast %3 : vector<64xf32> to vector<1x64xf32>
    %cst_4 = arith.constant 8.000000e+00 : f32
    %5 = vector.broadcast %cst_4 : f32 to vector<1x64xf32>
    %6 = arith.divf %4, %5 : vector<1x64xf32>
    %7 = vector.broadcast %6 : vector<1x64xf32> to vector<8x64xf32>
    %8 = arith.subf %2, %7 : vector<8x64xf32>
    %9 = arith.mulf %8, %8 : vector<8x64xf32>
    %cst_5 = arith.constant dense<0.000000e+00> : vector<64xf32>
    %10 = vector.multi_reduction <add>, %9, %cst_5 [0] : vector<8x64xf32> to vector<64xf32>
    %11 = vector.shape_cast %10 : vector<64xf32> to vector<1x64xf32>
    %cst_6 = arith.constant 8.000000e+00 : f32
    %12 = vector.broadcast %cst_6 : f32 to vector<1x64xf32>
    %13 = arith.divf %11, %12 : vector<1x64xf32>
    %c0_7 = arith.constant 0 : index
    %c0_8 = arith.constant 0 : index
    %14 = vector.load %arg2[%c0_7, %c0_8] : memref<1x64xf32, #tpu.memory_space<vmem>>, vector<1x64xf32>
    %cst_9 = arith.constant 9.99999974E-6 : f32
    %15 = vector.broadcast %cst_9 : f32 to vector<1x64xf32>
    %16 = arith.addf %13, %15 : vector<1x64xf32>
    %17 = math.rsqrt %16 : vector<1x64xf32>
    %18 = arith.mulf %14, %17 : vector<1x64xf32>
    %19 = vector.broadcast %18 : vector<1x64xf32> to vector<8x64xf32>
    %20 = arith.mulf %8, %19 : vector<8x64xf32>
    %c0_10 = arith.constant 0 : index
    %c0_11 = arith.constant 0 : index
    %21 = vector.load %arg3[%c0_10, %c0_11] : memref<1x64xf32, #tpu.memory_space<vmem>>, vector<1x64xf32>
    %22 = vector.broadcast %21 : vector<1x64xf32> to vector<8x64xf32>
    %23 = arith.addf %20, %22 : vector<8x64xf32>
    %cst_12 = arith.constant 0.000000e+00 : f32
    %24 = vector.broadcast %cst_12 : f32 to vector<8x64xf32>
    %25 = arith.maximumf %23, %24 : vector<8x64xf32>
    %26 = arith.truncf %25 : vector<8x64xf32> to vector<8x64xbf16>
    %c0_13 = arith.constant 0 : index
    %c0_14 = arith.constant 0 : index
    %27 = vector.load %arg4[%c0_13, %c0_14] : memref<64x32xbf16, #tpu.memory_space<vmem>>, vector<64x32xbf16>
    %cst_15 = arith.constant dense<0.000000e+00> : vector<8x32xf32>
    %28 = tpu.matmul %26, %27, %cst_15 {dimension_numbers = #tpu.dot_dimension_numbers<[1], [0], [0], [1], [0, 0, 1, 1], [], []>} : vector<8x64xbf16>, vector<64x32xbf16>, vector<8x32xf32> -> vector<8x32xf32>
    %cst_16 = arith.constant dense<0.000000e+00> : vector<32xf32>
    %29 = vector.multi_reduction <add>, %28, %cst_16 [0] : vector<8x32xf32> to vector<32xf32>
    %30 = vector.shape_cast %29 : vector<32xf32> to vector<1x32xf32>
    %cst_17 = arith.constant 8.000000e+00 : f32
    %31 = vector.broadcast %cst_17 : f32 to vector<1x32xf32>
    %32 = arith.divf %30, %31 : vector<1x32xf32>
    %33 = vector.broadcast %32 : vector<1x32xf32> to vector<8x32xf32>
    %34 = arith.subf %28, %33 : vector<8x32xf32>
    %35 = arith.mulf %34, %34 : vector<8x32xf32>
    %cst_18 = arith.constant dense<0.000000e+00> : vector<32xf32>
    %36 = vector.multi_reduction <add>, %35, %cst_18 [0] : vector<8x32xf32> to vector<32xf32>
    %37 = vector.shape_cast %36 : vector<32xf32> to vector<1x32xf32>
    %cst_19 = arith.constant 8.000000e+00 : f32
    %38 = vector.broadcast %cst_19 : f32 to vector<1x32xf32>
    %39 = arith.divf %37, %38 : vector<1x32xf32>
    %c0_20 = arith.constant 0 : index
    %c0_21 = arith.constant 0 : index
    %40 = vector.load %arg5[%c0_20, %c0_21] : memref<1x32xf32, #tpu.memory_space<vmem>>, vector<1x32xf32>
    %cst_22 = arith.constant 9.99999974E-6 : f32
    %41 = vector.broadcast %cst_22 : f32 to vector<1x32xf32>
    %42 = arith.addf %39, %41 : vector<1x32xf32>
    %43 = math.rsqrt %42 : vector<1x32xf32>
    %44 = arith.mulf %40, %43 : vector<1x32xf32>
    %45 = vector.broadcast %44 : vector<1x32xf32> to vector<8x32xf32>
    %46 = arith.mulf %34, %45 : vector<8x32xf32>
    %c0_23 = arith.constant 0 : index
    %c0_24 = arith.constant 0 : index
    %47 = vector.load %arg6[%c0_23, %c0_24] : memref<1x32xf32, #tpu.memory_space<vmem>>, vector<1x32xf32>
    %48 = vector.broadcast %47 : vector<1x32xf32> to vector<8x32xf32>
    %49 = arith.addf %46, %48 : vector<8x32xf32>
    %cst_25 = arith.constant 0.000000e+00 : f32
    %50 = vector.broadcast %cst_25 : f32 to vector<8x32xf32>
    %51 = arith.maximumf %49, %50 : vector<8x32xf32>
    %52 = arith.truncf %51 : vector<8x32xf32> to vector<8x32xbf16>
    %c0_26 = arith.constant 0 : index
    %c0_27 = arith.constant 0 : index
    %53 = vector.load %arg7[%c0_26, %c0_27] : memref<32x128xbf16, #tpu.memory_space<vmem>>, vector<32x128xbf16>
    %cst_28 = arith.constant dense<0.000000e+00> : vector<8x128xf32>
    %54 = tpu.matmul %52, %53, %cst_28 {dimension_numbers = #tpu.dot_dimension_numbers<[1], [0], [0], [1], [0, 0, 1, 1], [], []>} : vector<8x32xbf16>, vector<32x128xbf16>, vector<8x128xf32> -> vector<8x128xf32>
    %c0_29 = arith.constant 0 : index
    %c0_30 = arith.constant 0 : index
    %55 = vector.load %arg8[%c0_29, %c0_30] : memref<1x128xf32, #tpu.memory_space<vmem>>, vector<1x128xf32>
    %56 = vector.broadcast %55 : vector<1x128xf32> to vector<8x128xf32>
    %57 = arith.addf %54, %56 : vector<8x128xf32>
    %c0_31 = arith.constant 0 : index
    %c0_32 = arith.constant 0 : index
    %58 = vector.load %arg9[%c0_31, %c0_32] : memref<8x128xf32, #tpu.memory_space<vmem>>, vector<8x128xf32>
    tpu.vector_store %arg9[%c0_31, %c0_32], %57 {strides = array<i32>} : memref<8x128xf32, #tpu.memory_space<vmem>>, vector<8x128xf32>,
    return
  }
}

</mosaic_0001>

<bundles_post_ra>
// kernel: tpu_custom_call.1
= control target key start
LH: loop header
LB: loop body
LE: loop exit
PB: predicated region body
PF: predicated region fallthrough
CT: control target
= control target key end

     0   :  { %v423_v1 = vmov 0.0   ;;  %vm424_vm0 = vmmov 0   ;;  %vm51_vm1 = vcmask 261120   ;;  %s548_s0 = inlined_call_operand.vmem [shape: bf16[8,32], index: 0, kind: input, shape index: {}]   ;;  %s549_s1 = inlined_call_operand.vmem [shape: bf16[32,64], index: 1, kind: input, shape index: {}]   ;;  %s550_s2 = inlined_call_operand.vmem [shape: f32[1,64], index: 2, kind: input, shape index: {}]   ;;  %s551_s3 = inlined_call_operand.vmem [shape: f32[1,64], index: 3, kind: input, shape index: {}]   ;;  %s552_s4 = inlined_call_operand.vmem [shape: bf16[64,32], index: 4, kind: input, shape index: {}]   ;;  %s553_s5 = inlined_call_operand.vmem [shape: f32[1,32], index: 5, kind: input, shape index: {}]   ;;  %s554_s6 = inlined_call_operand.vmem [shape: f32[1,32], index: 6, kind: input, shape index: {}]   ;;  %s555_s7 = inlined_call_operand.vmem [shape: bf16[32,128], index: 7, kind: input, shape index: {}]   ;;  %s556_s8 = inlined_call_operand.vmem [shape: f32[1,128], index: 8, kind: input, shape index: {}]   ;;  %s557_s9 = inlined_call_operand.hbm [shape: f32[8,128], index: 9, kind: output, shape index: {}]  }
   0x1   :  { %v387_v0 = vld [vmem:[%s549_s1] sm:$0xff]   ;;  %356 = vmatprep.subr.bf16.mxu0 %v423_v1  ;;  %364 = vmatprep.subr.bf16.mxu1 %v423_v1  ;;  %v388_v2 = vld [vmem:[%s549_s1 + $0x8] sm:$0xff]  }
   0x2   :  { %357 = vmatpush3.bf16.msra.mxu0 %v387_v0  ;;  %360 = vmatprep.mubr.msk.bf16.mxu0 %vm424_vm0, %v423_v1  ;;  %v34_v3 = vld [vmem:[%s548_s0] sm:$0xf] }
   0x3   :  { %358 = vmatprep.subr.bf16.mxu0 %v423_v1  ;;  %372 = vmatprep.mubr.msk.bf16.mxu1 %vm424_vm0, %v423_v1 }
   0x6   :  { %359 = vmatpush3.bf16.msra.mxu0 %v388_v2 }
   0x7   :  { %14 = vsyncpa [#allocation3], 0  ;;  %376 = vmatprep.subr.bf16.mxu0 %v423_v1  ;;  %v389_v4 = vld [vmem:[%s552_s4] sm:$0xff]   ;;  %v390_v5 = vld [vmem:[%s552_s4 + $0x8] sm:$0xff]   ;;  %vm95_vm2 = vcmask 523264   ;;  %v120_v31 = vlaneseq  ;;  %s425_s10 = smov [#allocation2]  }
   0x8   :  { %365 = vmatpush3.bf16.msra.mxu1 %v389_v4  ;;  %v391_v6 = vld [vmem:[%s552_s4 + $0x10] sm:$0xff]   ;;  %v392_v7 = vld [vmem:[%s552_s4 + $0x18] sm:$0xff]   ;;  %v115_v33 = vld [vmem:[%s550_s2] sm:$0x1]  ;;  %s323_s11 = sshll.u32 %s425_s10, 4  ;;  %s324_s11 = int_to_ptr.vmem [resolvable:$true] %s323_s11 }
   0x9   :  { %361 = vmatmul.mubr.msk.bf16.vlgmr.msra.gmra.mrb[0].mxu0 %vm51_vm1, %v34_v3  ;;  %366 = vmatprep.subr.bf16.mxu1 %v423_v1  ;;  %v121_v32 = vshrl.u32 %v120_v31, 7  ;;  %v334_v38 = vld [vmem:[%s551_s3] ss:$0 sm:$0xff]  ;;  %v394_v44 = vld [vmem:[%s555_s7 + $0x8] sm:$0xff]   ;;  %p404_p1 = scmp.lt.s32.totalorder %s324_s11, %s324_s11 }
   0xa   :  { %380 = vmatprep.mubr.msk.bf16.mxu0 %vm424_vm0, %v423_v1  ;;  %v393_v43 = vld [vmem:[%s555_s7] sm:$0xff]  }
   0xb   :  { %v122_v34 = vsub.s32 0, %v121_v32  ;;  %377 = vmatpush3.bf16.msra.mxu0 %v393_v43  ;;  %v229_v4 = vld [vmem:[%s553_s5] sm:$0x1]  ;;  %s399_s5 = scalar_lea.vmem %s324_s11, 128 }
   0xc   :  { %367 = vmatpush3.bf16.msra.mxu1 %v390_v5  ;;  %378 = vmatprep.subr.bf16.mxu0 %v423_v1  ;;  %p400_p0 = scmp.ne.s32.totalorder %s324_s11, %s399_s5  ;;  %p405_p2 = scmp.lt.s32.totalorder %s399_s5, %s399_s5 }
   0xd   :  { %368 = vmatprep.subr.bf16.mxu1 %v423_v1 }
   0xe   :  { %p406_p3 = por %p405_p2, %p404_p1 }
   0xf   :  { %379 = vmatpush3.bf16.msra.mxu0 %v394_v44 }
  0x10   :  { %369 = vmatpush3.bf16.msra.mxu1 %v391_v6  ;;  %p407_p4 = pnand %p406_p3, %p400_p0 }
  0x11   :  { %370 = vmatprep.subr.bf16.mxu1 %v423_v1 }
  0x14   :  { %371 = vmatpush3.bf16.msra.mxu1 %v392_v7 }
  0xdc   :  { %v89_v8 = vpop.f32.mrb[0].mxu0 }
  0xdd   :  { %v96_v9 = vsel %vm95_vm2, %v89_v8, 0.0  ;;  %v362_v10 = vpop.f32.mrb[1].mxu0 }
  0xde   :  { %v97_v11 = vrot.slane %v96_v9, 4  ;;  %v92_v12 = vpop.f32.mrb[2].mxu0 }
  0xdf   :  { %v363_v13 = vpop.f32.mrb[3].mxu0 }
  0xe0   :  { %v98_v14 = vadd.f32 %v97_v11, %v96_v9  ;;  %v341_v13 = vld [vmem:[%s556_s8] ss:$0 sm:$0xff] }
  0xe2   :  { %v99_v15 = vrot.slane %v98_v14, 2 }
  0xe4   :  { %v100_v16 = vadd.f32 %v99_v15, %v98_v14 }
  0xe6   :  { %v101_v17 = vrot.slane %v100_v16, 1 }
  0xe8   :  { %v102_v18 = vadd.f32 %v101_v17, %v100_v16 }
  0xea   :  { %v104_v19 = vmul.f32 0.125, %v102_v18 }
  0xec   :  { %v105_v20 = vsub.f32 %v89_v8, %v104_v19  ;;  %v340_v8 = vld [vmem:[%s554_s6] ss:$0 sm:$0xff] }
  0xee   :  { %v106_v21 = vmul.f32 %v105_v20, %v105_v20 }
  0xf0   :  { %v107_v22 = vsel %vm95_vm2, %v106_v21, 0.0 }
  0xf1   :  { %v108_v23 = vrot.slane %v107_v22, 4 }
  0xf3   :  { %v109_v24 = vadd.f32 %v108_v23, %v107_v22 }
  0xf5   :  { %v110_v25 = vrot.slane %v109_v24, 2 }
  0xf7   :  { %v111_v26 = vadd.f32 %v110_v25, %v109_v24 }
  0xf9   :  { %v112_v27 = vrot.slane %v111_v26, 1 }
  0xfb   :  { %v113_v28 = vadd.f32 %v112_v27, %v111_v26 }
  0xfd   :  { %v114_v29 = vmul.f32 0.125, %v113_v28 }
  0xff   :  { %v116_v30 = vadd.f32 1e-05, %v114_v29 }
 0x101   :  { %395 = vrsqrt.f32 %v116_v30 }
 0x10b   :  { %v396_v35 = vpop.eup %395 }
 0x10c   :  { %v118_v36 = vmul.f32 %v396_v35, %v115_v33 }
 0x10e   :  { %v123_v37 = vrot.slane %v118_v36, %v122_v34 }
 0x110   :  { %v125_v39 = vmul.f32 %v123_v37, %v105_v20 }
 0x112   :  { %v133_v40 = vadd.f32 %v334_v38, %v125_v39 }
 0x114   :  { %v134_v41 = vmax.f32 %v133_v40, 0.0 }
 0x116   :  { %v135_v42 = vpack.c.bf16 %v134_v41, %v134_v41 }
 0x118   :  { %373 = vmatmul.mubr.msk.bf16.vlgmr.msra.gmra.mrb[0].mxu1 %vm95_vm2, %v135_v42 }
 0x1eb   :  { %v205_v45 = vpop.f32.mrb[0].mxu1 }
 0x1ec   :  { %v211_v46 = vsel %vm51_vm1, %v205_v45, 0.0  ;;  %v374_v47 = vpop.f32.mrb[1].mxu1 }
 0x1ed   :  { %v212_v48 = vrot.slane %v211_v46, 4  ;;  %v208_v49 = vpop.f32.mrb[2].mxu1 }
 0x1ee   :  { %v375_v50 = vpop.f32.mrb[3].mxu1 }
 0x1ef   :  { %v213_v51 = vadd.f32 %v212_v48, %v211_v46 }
 0x1f1   :  { %v214_v52 = vrot.slane %v213_v51, 2 }
 0x1f3   :  { %v215_v53 = vadd.f32 %v214_v52, %v213_v51 }
 0x1f5   :  { %v216_v54 = vrot.slane %v215_v53, 1 }
 0x1f7   :  { %v217_v55 = vadd.f32 %v216_v54, %v215_v53 }
 0x1f9   :  { %v218_v56 = vmul.f32 0.125, %v217_v55 }
 0x1fb   :  { %v219_v57 = vsub.f32 %v205_v45, %v218_v56 }
 0x1fd   :  { %v220_v58 = vmul.f32 %v219_v57, %v219_v57 }
 0x1ff   :  { %v221_v59 = vsel %vm51_vm1, %v220_v58, 0.0 }
 0x200   :  { %v222_v60 = vrot.slane %v221_v59, 4 }
 0x202   :  { %v223_v61 = vadd.f32 %v222_v60, %v221_v59 }
 0x204   :  { %v224_v62 = vrot.slane %v223_v61, 2 }
 0x206   :  { %v225_v63 = vadd.f32 %v224_v62, %v223_v61 }
 0x208   :  { %v226_v0 = vrot.slane %v225_v63, 1 }
 0x20a   :  { %v227_v1 = vadd.f32 %v226_v0, %v225_v63 }
 0x20c   :  { %v228_v2 = vmul.f32 0.125, %v227_v1 }
 0x20e   :  { %v230_v3 = vadd.f32 1e-05, %v228_v2 }
 0x210   :  { %397 = vrsqrt.f32 %v230_v3 }
 0x21a   :  { %v398_v5 = vpop.eup %397 }
 0x21b   :  { %v232_v6 = vmul.f32 %v398_v5, %v229_v4 }
 0x21d   :  { %v237_v7 = vrot.slane %v232_v6, %v122_v34 }
 0x21f   :  { %v239_v9 = vmul.f32 %v237_v7, %v219_v57 }
 0x221   :  { %v247_v10 = vadd.f32 %v340_v8, %v239_v9 }
 0x223   :  { %v248_v11 = vmax.f32 %v247_v10, 0.0 }
 0x225   :  { %v249_v12 = vpack.c.bf16 %v248_v11, %v248_v11 }
 0x227   :  { %381 = vmatmul.mubr.msk.bf16.vlgmr.msra.gmra.mrb[4].mxu0 %vm51_vm1, %v249_v12 }
 0x2fa   :  { %v310_v14 = vpop.f32.mrb[4].mxu0 }
 0x2fb   :  { %v311_v15 = vadd.f32 %v341_v13, %v310_v14  ;;  %v382_v16 = vpop.f32.mrb[5].mxu0 }
 0x2fc   :  { %v313_v17 = vpop.f32.mrb[6].mxu0 }
 0x2fd   :  { %316 = vst [vmem:[#allocation2] sm:$0xff] %v311_v15  ;;  %v383_v18 = vpop.f32.mrb[7].mxu0 }
 0x2fe   :  { %410 = shalt.err (!%p407_p4)
}
 0x2ff   :  { %s411_s8 = scalar_lea.hbm %s557_s9, 128 }
 0x300   :  { %p412_p5 = scmp.ne.s32.totalorder %s557_s9, %s411_s8  ;;  %p415_p6 = scmp.lt.u32.totalorder %s411_s8, %s557_s9 }
 0x302   :  { %p417_p7 = pnand %p415_p6, %p412_p5 }
 0x304   :  { %420 = shalt.err (!%p417_p7)
}
 0x305   :  { %326 = dma.vmem_to_hbm [thread:$0]  %s324_s11, 128, %s557_s9, [#allocation3]  }
 0x306   :  { %421 = dma.done.wait [#allocation3], 128  }
 0x307   :  { %422 = vsyncadd [#allocation3], 4294967168 }
 0x308   :  { %330 = vsyncpa [#allocation3], 1 }

</bundles_post_ra>
